<compile_context>
chip_gen: v5e
topology: v5e:2x2
jax: 0.10.0
libtpu: 0.0.40
codegen_flags: <defaults>
</compile_context>

<pallas_src>
import math

import jax
import jax.numpy as jnp
from jax import lax
from jax.experimental import pallas as pl
from jax.experimental.pallas import tpu as pltpu


def _round_up(x, m):
    return (x + m - 1) // m * m


def _critic_kernel(s_ref, a_ref, w1s_ref, w1a_ref, b1_ref, w2_ref, b2_ref,
                   w3t_ref, b3_ref, o_ref):
    """One batch tile of the critic MLP.

    s_ref   : (TILE_B, num_states)   compute dtype (f32 or bf16)
    a_ref   : (TILE_B, num_actions)  compute dtype
    w1s_ref : (num_states, H1)       compute dtype (top rows of W1)
    w1a_ref : (num_actions, H1)      compute dtype (bottom rows of W1)
    b1_ref  : (1, H1)  f32
    w2_ref  : (H1, H2)               compute dtype
    b2_ref  : (1, H2)  f32
    w3t_ref : (1, H2)                compute dtype (head weight as a row vector)
    b3_ref  : (1, 1)   f32
    o_ref   : (1, TILE_B) f32        batch on the lane axis (lane-dense store)
    """
    # Fused concat: concat(s, a) @ W1 == s @ W1[:ns] + a @ W1[ns:]
    h1 = jnp.dot(s_ref[...], w1s_ref[...], preferred_element_type=jnp.float32)
    h1 = h1 + jnp.dot(a_ref[...], w1a_ref[...], preferred_element_type=jnp.float32)
    h1 = jnp.maximum(h1 + b1_ref[...], 0.0)          # bias/ReLU in f32 (VPU)

    h2 = jnp.dot(h1.astype(w2_ref.dtype), w2_ref[...],
                 preferred_element_type=jnp.float32)
    h2 = jnp.maximum(h2 + b2_ref[...], 0.0)

    # Head as (1, H2) contracted with (TILE_B, H2) on H2 -> (1, TILE_B):
    # the result lands with batch on lanes, so the writeback is a dense vst.
    out_row = lax.dot_general(
        w3t_ref[...], h2.astype(w3t_ref.dtype),
        dimension_numbers=(((1,), (1,)), ((), ())),
        preferred_element_type=jnp.float32)
    o_ref[...] = (out_row + b3_ref[...]).astype(o_ref.dtype)


def critic_forward(state, action, params, *, tile_b=1024,
                   compute_dtype=jnp.float32):
    """state: [B, num_states], action: [B, num_actions] -> [B, 1] (f32)."""
    w1s, w1a, b1, w2, b2, w3t, b3 = params
    num_states = state.shape[-1]
    num_actions = action.shape[-1]
    H1 = w1s.shape[1]
    H2 = w2.shape[1]
    B = state.shape[0]

    # Batch tile: multiple of 128 (lane width), no larger than the padded batch.
    tile_b = _round_up(max(128, min(tile_b, _round_up(B, 128))), 128)
    Bp = _round_up(B, tile_b)
    num_tiles = Bp // tile_b

    state_c = state.astype(compute_dtype)
    action_c = action.astype(compute_dtype)
    if Bp != B:  # only for batches that are not a multiple of the tile
        state_c = jnp.pad(state_c, ((0, Bp - B), (0, 0)))
        action_c = jnp.pad(action_c, ((0, Bp - B), (0, 0)))

    w1s_c = w1s.astype(compute_dtype)
    w1a_c = w1a.astype(compute_dtype)
    w2_c = w2.astype(compute_dtype)
    w3t_c = w3t.astype(compute_dtype)
    b1_f = b1.astype(jnp.float32)
    b2_f = b2.astype(jnp.float32)
    b3_f = b3.astype(jnp.float32)

    itemsize = jnp.dtype(compute_dtype).itemsize
    d_in = num_states + num_actions
    weight_bytes = ((w1s_c.size + w1a_c.size + w2_c.size + w3t_c.size) * itemsize
                    + (b1_f.size + b2_f.size + b3_f.size) * 4)
    cost = pl.CostEstimate(
        flops=2 * Bp * (d_in * H1 + H1 * H2 + H2),
        transcendentals=0,
        bytes_accessed=Bp * d_in * itemsize + Bp * 4 + weight_bytes)

    const = lambda i: (0, 0)   # weights/biases: same block every step (VMEM-resident)

    out = pl.pallas_call(
        _critic_kernel,
        out_shape=jax.ShapeDtypeStruct((1, Bp), jnp.float32),
        grid=(num_tiles,),
        in_specs=[
            pl.BlockSpec((tile_b, num_states), lambda i: (i, 0)),
            pl.BlockSpec((tile_b, num_actions), lambda i: (i, 0)),
            pl.BlockSpec((num_states, H1), const),
            pl.BlockSpec((num_actions, H1), const),
            pl.BlockSpec((1, H1), const),
            pl.BlockSpec((H1, H2), const),
            pl.BlockSpec((1, H2), const),
            pl.BlockSpec((1, H2), const),
            pl.BlockSpec((1, 1), const),
        ],
        out_specs=pl.BlockSpec((1, tile_b), lambda i: (0, i)),
        compiler_params=pltpu.CompilerParams(
            dimension_semantics=("parallel",)),
        cost_estimate=cost,
    )(state_c, action_c, w1s_c, w1a_c, b1_f, w2_c, b2_f, w3t_c, b3_f)

    return out[0, :B].reshape(B, 1)


def init_critic_params(key, num_states, num_actions, num_hidden_l1, num_hidden_l2):
    """Deterministic init mimicking PyTorch nn.Linear defaults:
    U(-1/sqrt(fan_in), 1/sqrt(fan_in)) for both weight and bias."""
    def linear(key, fan_in, fan_out):
        kw, kb = jax.random.split(key)
        bound = 1.0 / math.sqrt(fan_in)
        w = jax.random.uniform(kw, (fan_in, fan_out), jnp.float32, -bound, bound)
        b = jax.random.uniform(kb, (1, fan_out), jnp.float32, -bound, bound)
        return w, b

    k1, k2, k3 = jax.random.split(key, 3)
    d_in = num_states + num_actions
    w1, b1 = linear(k1, d_in, num_hidden_l1)
    w2, b2 = linear(k2, num_hidden_l1, num_hidden_l2)
    w3, b3 = linear(k3, num_hidden_l2, 1)
    # Split W1 so the kernel never needs a materialized concat([state, action]).
    w1s, w1a = w1[:num_states], w1[num_states:]
    # Store the head weight as a row vector (1, H2) for the lane-dense final dot.
    w3t = w3.T
    return (w1s, w1a, b1, w2, b2, w3t, b3)


def _reference_forward(state, action, params):
    """Pure-JAX reference matching the PyTorch Critic forward."""
    w1s, w1a, b1, w2, b2, w3t, b3 = params
    x = jnp.concatenate([state, action], axis=-1).astype(jnp.float32)
    w1 = jnp.concatenate([w1s, w1a], axis=0)
    h1 = jnp.maximum(x @ w1 + b1, 0.0)
    h2 = jnp.maximum(h1 @ w2 + b2, 0.0)
    return h2 @ w3t.T + b3


if __name__ == "__main__":
    num_states, num_actions = 16, 4
    num_hidden_l1, num_hidden_l2 = 32, 32
    batch = 2

    key = jax.random.PRNGKey(0)
    k_params, k_state, k_action = jax.random.split(key, 3)

    params = init_critic_params(k_params, num_states, num_actions,
                                num_hidden_l1, num_hidden_l2)
    state = jax.random.normal(k_state, (batch, num_states), jnp.float32)
    action = jax.random.normal(k_action, (batch, num_actions), jnp.float32)

    ref = _reference_forward(state, action, params)

    # f32 path: must match the reference tightly.
    out = critic_forward(state, action, params)
    out = jax.block_until_ready(out)
    assert out.shape == (batch, 1), out.shape
    assert jnp.allclose(out, ref, atol=1e-5, rtol=1e-5), (out, ref)

    # bf16 input/weight path (f32 accumulation): halves HBM traffic on the
    # mem-bound input stream; looser tolerance against the f32 reference.
    out_bf16 = critic_forward(state, action, params, compute_dtype=jnp.bfloat16)
    out_bf16 = jax.block_until_ready(out_bf16)
    assert out_bf16.shape == (batch, 1), out_bf16.shape
    assert jnp.allclose(out_bf16, ref, atol=5e-2, rtol=5e-2), (out_bf16, ref)

    print("KERNEL_OK")
</pallas_src>

<mosaic_0001>
module attributes {stable_mosaic.version = 11 : i64} {
  func.func @_critic_kernel(%arg0: i32, %arg1: memref<128x16xf32, #tpu.memory_space<vmem>>, %arg2: memref<128x4xf32, #tpu.memory_space<vmem>>, %arg3: memref<16x32xf32, #tpu.memory_space<vmem>>, %arg4: memref<4x32xf32, #tpu.memory_space<vmem>>, %arg5: memref<1x32xf32, #tpu.memory_space<vmem>>, %arg6: memref<32x32xf32, #tpu.memory_space<vmem>>, %arg7: memref<1x32xf32, #tpu.memory_space<vmem>>, %arg8: memref<1x32xf32, #tpu.memory_space<vmem>>, %arg9: memref<1x1xf32, #tpu.memory_space<vmem>>, %arg10: memref<1x128xf32, #tpu.memory_space<vmem>>) attributes {dimension_semantics = [#tpu.dimension_semantics<parallel>], iteration_bounds = array<i64: 1>, scalar_prefetch = 0 : i64, scratch_operands = 0 : i64, tpu.core_type = #tpu.core_type<tc>, window_params = [{transform_indices = @transform_0, window_bounds = array<i64: 128, 16>}, {transform_indices = @transform_1, window_bounds = array<i64: 128, 4>}, {pipeline_mode = #tpu.pipeline_mode<synchronous>, transform_indices = @transform_2, window_bounds = array<i64: 16, 32>}, {pipeline_mode = #tpu.pipeline_mode<synchronous>, transform_indices = @transform_3, window_bounds = array<i64: 4, 32>}, {pipeline_mode = #tpu.pipeline_mode<synchronous>, transform_indices = @transform_4, window_bounds = array<i64: 1, 32>}, {pipeline_mode = #tpu.pipeline_mode<synchronous>, transform_indices = @transform_5, window_bounds = array<i64: 32, 32>}, {pipeline_mode = #tpu.pipeline_mode<synchronous>, transform_indices = @transform_6, window_bounds = array<i64: 1, 32>}, {pipeline_mode = #tpu.pipeline_mode<synchronous>, transform_indices = @transform_7, window_bounds = array<i64: 1, 32>}, {pipeline_mode = #tpu.pipeline_mode<synchronous>, transform_indices = @transform_8, window_bounds = array<i64: 1, 1>}, {transform_indices = @transform_9, window_bounds = array<i64: 1, 128>}]} {
    %c0 = arith.constant 0 : index
    %c0_0 = arith.constant 0 : index
    %0 = vector.load %arg1[%c0, %c0_0] : memref<128x16xf32, #tpu.memory_space<vmem>>, vector<128x16xf32>
    %c0_1 = arith.constant 0 : index
    %c0_2 = arith.constant 0 : index
    %1 = vector.load %arg3[%c0_1, %c0_2] : memref<16x32xf32, #tpu.memory_space<vmem>>, vector<16x32xf32>
    %cst = arith.constant dense<0.000000e+00> : vector<128x32xf32>
    %2 = tpu.matmul %0, %1, %cst {dimension_numbers = #tpu.dot_dimension_numbers<[1], [0], [0], [1], [0, 0, 1, 1], [], []>} : vector<128x16xf32>, vector<16x32xf32>, vector<128x32xf32> -> vector<128x32xf32>
    %c0_3 = arith.constant 0 : index
    %c0_4 = arith.constant 0 : index
    %3 = vector.load %arg2[%c0_3, %c0_4] : memref<128x4xf32, #tpu.memory_space<vmem>>, vector<128x4xf32>
    %c0_5 = arith.constant 0 : index
    %c0_6 = arith.constant 0 : index
    %4 = vector.load %arg4[%c0_5, %c0_6] : memref<4x32xf32, #tpu.memory_space<vmem>>, vector<4x32xf32>
    %cst_7 = arith.constant dense<0.000000e+00> : vector<128x32xf32>
    %5 = tpu.matmul %3, %4, %cst_7 {dimension_numbers = #tpu.dot_dimension_numbers<[1], [0], [0], [1], [0, 0, 1, 1], [], []>} : vector<128x4xf32>, vector<4x32xf32>, vector<128x32xf32> -> vector<128x32xf32>
    %6 = arith.addf %2, %5 : vector<128x32xf32>
    %c0_8 = arith.constant 0 : index
    %c0_9 = arith.constant 0 : index
    %7 = vector.load %arg5[%c0_8, %c0_9] : memref<1x32xf32, #tpu.memory_space<vmem>>, vector<1x32xf32>
    %8 = vector.broadcast %7 : vector<1x32xf32> to vector<128x32xf32>
    %9 = arith.addf %6, %8 : vector<128x32xf32>
    %cst_10 = arith.constant 0.000000e+00 : f32
    %10 = vector.broadcast %cst_10 : f32 to vector<128x32xf32>
    %11 = arith.maximumf %9, %10 : vector<128x32xf32>
    %c0_11 = arith.constant 0 : index
    %c0_12 = arith.constant 0 : index
    %12 = vector.load %arg6[%c0_11, %c0_12] : memref<32x32xf32, #tpu.memory_space<vmem>>, vector<32x32xf32>
    %cst_13 = arith.constant dense<0.000000e+00> : vector<128x32xf32>
    %13 = tpu.matmul %11, %12, %cst_13 {dimension_numbers = #tpu.dot_dimension_numbers<[1], [0], [0], [1], [0, 0, 1, 1], [], []>} : vector<128x32xf32>, vector<32x32xf32>, vector<128x32xf32> -> vector<128x32xf32>
    %c0_14 = arith.constant 0 : index
    %c0_15 = arith.constant 0 : index
    %14 = vector.load %arg7[%c0_14, %c0_15] : memref<1x32xf32, #tpu.memory_space<vmem>>, vector<1x32xf32>
    %15 = vector.broadcast %14 : vector<1x32xf32> to vector<128x32xf32>
    %16 = arith.addf %13, %15 : vector<128x32xf32>
    %cst_16 = arith.constant 0.000000e+00 : f32
    %17 = vector.broadcast %cst_16 : f32 to vector<128x32xf32>
    %18 = arith.maximumf %16, %17 : vector<128x32xf32>
    %c0_17 = arith.constant 0 : index
    %c0_18 = arith.constant 0 : index
    %19 = vector.load %arg8[%c0_17, %c0_18] : memref<1x32xf32, #tpu.memory_space<vmem>>, vector<1x32xf32>
    %cst_19 = arith.constant dense<0.000000e+00> : vector<1x128xf32>
    %20 = tpu.matmul %19, %18, %cst_19 {dimension_numbers = #tpu.dot_dimension_numbers<[1], [1], [0], [0], [0, 0, 1, 0], [], []>} : vector<1x32xf32>, vector<128x32xf32>, vector<1x128xf32> -> vector<1x128xf32>
    %c0_20 = arith.constant 0 : index
    %c0_21 = arith.constant 0 : index
    %21 = vector.load %arg9[%c0_20, %c0_21] : memref<1x1xf32, #tpu.memory_space<vmem>>, vector<1x1xf32>
    %22 = vector.broadcast %21 : vector<1x1xf32> to vector<1x128xf32>
    %23 = arith.addf %20, %22 : vector<1x128xf32>
    %c0_22 = arith.constant 0 : index
    %c0_23 = arith.constant 0 : index
    %24 = vector.load %arg10[%c0_22, %c0_23] : memref<1x128xf32, #tpu.memory_space<vmem>>, vector<1x128xf32>
    tpu.vector_store %arg10[%c0_22, %c0_23], %23 {strides = array<i32>} : memref<1x128xf32, #tpu.memory_space<vmem>>, vector<1x128xf32>,
    return
  }
  func.func @transform_0(%arg0: i32) -> (i32, i32) {
    %c0_i32 = arith.constant 0 : i32
    %c0_i32_0 = arith.constant 0 : i32
    return %arg0, %c0_i32 : i32, i32
  }
  func.func @transform_1(%arg0: i32) -> (i32, i32) {
    %c0_i32 = arith.constant 0 : i32
    %c0_i32_0 = arith.constant 0 : i32
    return %arg0, %c0_i32 : i32, i32
  }
  func.func @transform_2(%arg0: i32) -> (i32, i32) {
    %c0_i32 = arith.constant 0 : i32
    %c0_i32_0 = arith.constant 0 : i32
    %c0_i32_1 = arith.constant 0 : i32
    return %c0_i32, %c0_i32_0 : i32, i32
  }
  func.func @transform_3(%arg0: i32) -> (i32, i32) {
    %c0_i32 = arith.constant 0 : i32
    %c0_i32_0 = arith.constant 0 : i32
    %c0_i32_1 = arith.constant 0 : i32
    return %c0_i32, %c0_i32_0 : i32, i32
  }
  func.func @transform_4(%arg0: i32) -> (i32, i32) {
    %c0_i32 = arith.constant 0 : i32
    %c0_i32_0 = arith.constant 0 : i32
    %c0_i32_1 = arith.constant 0 : i32
    return %c0_i32, %c0_i32_0 : i32, i32
  }
  func.func @transform_5(%arg0: i32) -> (i32, i32) {
    %c0_i32 = arith.constant 0 : i32
    %c0_i32_0 = arith.constant 0 : i32
    %c0_i32_1 = arith.constant 0 : i32
    return %c0_i32, %c0_i32_0 : i32, i32
  }
  func.func @transform_6(%arg0: i32) -> (i32, i32) {
    %c0_i32 = arith.constant 0 : i32
    %c0_i32_0 = arith.constant 0 : i32
    %c0_i32_1 = arith.constant 0 : i32
    return %c0_i32, %c0_i32_0 : i32, i32
  }
  func.func @transform_7(%arg0: i32) -> (i32, i32) {
    %c0_i32 = arith.constant 0 : i32
    %c0_i32_0 = arith.constant 0 : i32
    %c0_i32_1 = arith.constant 0 : i32
    return %c0_i32, %c0_i32_0 : i32, i32
  }
  func.func @transform_8(%arg0: i32) -> (i32, i32) {
    %c0_i32 = arith.constant 0 : i32
    %c0_i32_0 = arith.constant 0 : i32
    %c0_i32_1 = arith.constant 0 : i32
    return %c0_i32, %c0_i32_0 : i32, i32
  }
  func.func @transform_9(%arg0: i32) -> (i32, i32) {
    %c0_i32 = arith.constant 0 : i32
    %c0_i32_0 = arith.constant 0 : i32
    return %c0_i32, %arg0 : i32, i32
  }
}

</mosaic_0001>

<bundles_post_ra>
// kernel: tpu_custom_call.1
= control target key start
LH: loop header
LB: loop body
LE: loop exit
PB: predicated region body
PF: predicated region fallthrough
CT: control target
= control target key end

     0   :  { %s939_s0 = inlined_call_operand.vmem [shape: f32[128,16], index: 0, kind: input, shape index: {}]   ;;  %s940_s1 = inlined_call_operand.vmem [shape: f32[128,4], index: 1, kind: input, shape index: {}]   ;;  %s941_s2 = inlined_call_operand.vmem [shape: f32[16,32], index: 2, kind: input, shape index: {}]   ;;  %s942_s3 = inlined_call_operand.vmem [shape: f32[4,32], index: 3, kind: input, shape index: {}]   ;;  %s943_s4 = inlined_call_operand.vmem [shape: f32[1,32], index: 4, kind: input, shape index: {}]   ;;  %s944_s5 = inlined_call_operand.vmem [shape: f32[32,32], index: 5, kind: input, shape index: {}]   ;;  %s945_s6 = inlined_call_operand.vmem [shape: f32[1,32], index: 6, kind: input, shape index: {}]   ;;  %s946_s7 = inlined_call_operand.vmem [shape: f32[1,32], index: 7, kind: input, shape index: {}]   ;;  %s947_s8 = inlined_call_operand.<no memory space> [shape: f32[1,1], index: 8, kind: input, shape index: {}]   ;;  %s948_s9 = inlined_call_operand.hbm [shape: f32[1,128], index: 9, kind: output, shape index: {}]  }
   0x1   :  { %v14_v0 = vstv %s947_s8 }
   0x2   :  { %15 = vst [vmem:[#allocation2] sm:$0x1] %v14_v0 }
   0x3   :  { %v52_v1 = vld [vmem:[%s941_s2 + $0x8] sm:$0xff]  ;;  %v69_v2 = vld [vmem:[%s942_s3] sm:$0xf]  ;;  %vm119_vm0 = vcmask 1043456   ;;  %vm70_vm1 = vcmask 31744   ;;  %vm188_vm2 = vcmask 130048  }
   0x4   :  { %v51_v3 = vld [vmem:[%s941_s2] sm:$0xff]  ;;  %251 = vmatpush.msra.mxu1 %v52_v1  ;;  %572 = vmatpush.msk.msra.mxu0 %vm119_vm0, %v69_v2 }
   0x5   :  { %v53_v4 = vld [vmem:[%s940_s1] sm:$0xff] }
   0x6   :  { %v35_v5 = vld [vmem:[%s939_s0] sm:$0xff]  ;;  %573 = vmatmul.msk.f32.vlgmr.msra.gmra.mxu0 %vm70_vm1, %v53_v4  ;;  %252 = vmatpush.msra.mxu1 %v51_v3 }
   0x7   :  { %589 = vmatmul.msk.f32.vlgmr.msra.gmra.mxu1 %vm188_vm2, %v35_v5 }
   0x8   :  { %16 = vsyncpa [#allocation4], 0  ;;  %v54_v6 = vld [vmem:[%s940_s1 + $0x8] sm:$0xff]  ;;  %v55_v8 = vld [vmem:[%s940_s1 + $0x10] sm:$0xff]  ;;  %vm346_vm3 = vcmask 261120   ;;  %s670_s18 = smov [#allocation3]  }
   0x9   :  { %v36_v7 = vld [vmem:[%s939_s0 + $0x8] sm:$0xff]  ;;  %v37_v9 = vld [vmem:[%s939_s0 + $0x10] sm:$0xff]  ;;  %v56_v10 = vld [vmem:[%s940_s1 + $0x18] sm:$0xff]  ;;  %s561_s8 = sshll.u32 %s670_s18, 4  ;;  %s563_s2 = sshll.u32 %s948_s9, 4  ;;  %s562_s8 = int_to_ptr.vmem [resolvable:$true] %s561_s8  ;;  %s564_s2 = int_to_ptr.hbm [resolvable:$true] %s563_s2 }
   0xa   :  { %v38_v11 = vld [vmem:[%s939_s0 + $0x18] sm:$0xff]  ;;  %v57_v12 = vld [vmem:[%s940_s1 + $0x20] sm:$0xff]  ;;  %v58_v14 = vld [vmem:[%s940_s1 + $0x28] sm:$0xff] }
   0xb   :  { %v39_v13 = vld [vmem:[%s939_s0 + $0x20] sm:$0xff]  ;;  %v40_v15 = vld [vmem:[%s939_s0 + $0x28] sm:$0xff]  ;;  %v59_v16 = vld [vmem:[%s940_s1 + $0x30] sm:$0xff] }
   0xc   :  { %v41_v17 = vld [vmem:[%s939_s0 + $0x30] sm:$0xff]  ;;  %v60_v18 = vld [vmem:[%s940_s1 + $0x38] sm:$0xff]  ;;  %v61_v20 = vld [vmem:[%s940_s1 + $0x40] sm:$0xff] }
   0xd   :  { %v42_v19 = vld [vmem:[%s939_s0 + $0x38] sm:$0xff]  ;;  %v43_v21 = vld [vmem:[%s939_s0 + $0x40] sm:$0xff]  ;;  %v62_v22 = vld [vmem:[%s940_s1 + $0x48] sm:$0xff] }
   0xe   :  { %574 = vmatmul.msk.f32.gmra.mxu0 %vm70_vm1, %v54_v6  ;;  %v44_v23 = vld [vmem:[%s939_s0 + $0x48] sm:$0xff]  ;;  %v63_v24 = vld [vmem:[%s940_s1 + $0x50] sm:$0xff]  ;;  %v64_v26 = vld [vmem:[%s940_s1 + $0x58] sm:$0xff] }
   0xf   :  { %590 = vmatmul.msk.f32.gmra.mxu1 %vm188_vm2, %v36_v7  ;;  %v45_v25 = vld [vmem:[%s939_s0 + $0x50] sm:$0xff]  ;;  %v46_v27 = vld [vmem:[%s939_s0 + $0x58] sm:$0xff]  ;;  %v65_v28 = vld [vmem:[%s940_s1 + $0x60] sm:$0xff] }
  0x10   :  { %v341_v29 = vld [vmem:[%s944_s5 + $0x18] sm:$0xff]  ;;  %v47_v30 = vld [vmem:[%s939_s0 + $0x60] sm:$0xff]  ;;  %v340_v31 = vld [vmem:[%s944_s5 + $0x10] sm:$0xff] }
  0x11   :  { %407 = vmatpush.msra.mxu2 %v341_v29  ;;  %v339_v32 = vld [vmem:[%s944_s5 + $0x8] sm:$0xff]  ;;  %v338_v33 = vld [vmem:[%s944_s5] sm:$0xff]  ;;  %v67_v36 = vld [vmem:[%s940_s1 + $0x70] sm:$0xff] }
  0x12   :  { %v66_v34 = vld [vmem:[%s940_s1 + $0x68] sm:$0xff]  ;;  %v49_v37 = vld [vmem:[%s939_s0 + $0x70] sm:$0xff]  ;;  %v68_v38 = vld [vmem:[%s940_s1 + $0x78] sm:$0xff] }
  0x13   :  { %408 = vmatpush.msra.mxu2 %v340_v31  ;;  %v48_v35 = vld [vmem:[%s939_s0 + $0x68] sm:$0xff]  ;;  %v50_v39 = vld [vmem:[%s939_s0 + $0x78] sm:$0xff]  ;;  %v876_v41 = vld [vmem:[%s943_s4] ss:$0 sm:$0xff] }
  0x15   :  { %409 = vmatpush.msra.mxu2 %v339_v32 }
  0x16   :  { %575 = vmatmul.msk.f32.gmra.mxu0 %vm70_vm1, %v55_v8 }
  0x17   :  { %591 = vmatmul.msk.f32.gmra.mxu1 %vm188_vm2, %v37_v9  ;;  %410 = vmatpush.msra.mxu2 %v338_v33 }
  0x1e   :  { %576 = vmatmul.msk.f32.gmra.mxu0 %vm70_vm1, %v56_v10 }
  0x1f   :  { %592 = vmatmul.msk.f32.gmra.mxu1 %vm188_vm2, %v38_v11 }
  0x26   :  { %577 = vmatmul.msk.f32.gmra.mxu0 %vm70_vm1, %v57_v12 }
  0x27   :  { %593 = vmatmul.msk.f32.gmra.mxu1 %vm188_vm2, %v39_v13 }
  0x2e   :  { %578 = vmatmul.msk.f32.gmra.mxu0 %vm70_vm1, %v58_v14 }
  0x2f   :  { %594 = vmatmul.msk.f32.gmra.mxu1 %vm188_vm2, %v40_v15 }
  0x36   :  { %579 = vmatmul.msk.f32.gmra.mxu0 %vm70_vm1, %v59_v16 }
  0x37   :  { %595 = vmatmul.msk.f32.gmra.mxu1 %vm188_vm2, %v41_v17 }
  0x3e   :  { %580 = vmatmul.msk.f32.gmra.mxu0 %vm70_vm1, %v60_v18 }
  0x3f   :  { %596 = vmatmul.msk.f32.gmra.mxu1 %vm188_vm2, %v42_v19 }
  0x46   :  { %581 = vmatmul.msk.f32.gmra.mxu0 %vm70_vm1, %v61_v20 }
  0x47   :  { %597 = vmatmul.msk.f32.gmra.mxu1 %vm188_vm2, %v43_v21 }
  0x4e   :  { %582 = vmatmul.msk.f32.gmra.mxu0 %vm70_vm1, %v62_v22 }
  0x4f   :  { %598 = vmatmul.msk.f32.gmra.mxu1 %vm188_vm2, %v44_v23 }
  0x56   :  { %583 = vmatmul.msk.f32.gmra.mxu0 %vm70_vm1, %v63_v24 }
  0x57   :  { %599 = vmatmul.msk.f32.gmra.mxu1 %vm188_vm2, %v45_v25 }
  0x5e   :  { %584 = vmatmul.msk.f32.gmra.mxu0 %vm70_vm1, %v64_v26 }
  0x5f   :  { %600 = vmatmul.msk.f32.gmra.mxu1 %vm188_vm2, %v46_v27 }
  0x66   :  { %585 = vmatmul.msk.f32.gmra.mxu0 %vm70_vm1, %v65_v28 }
  0x67   :  { %601 = vmatmul.msk.f32.gmra.mxu1 %vm188_vm2, %v47_v30 }
  0x6e   :  { %586 = vmatmul.msk.f32.gmra.mxu0 %vm70_vm1, %v66_v34 }
  0x6f   :  { %602 = vmatmul.msk.f32.gmra.mxu1 %vm188_vm2, %v48_v35 }
  0x76   :  { %587 = vmatmul.msk.f32.gmra.mxu0 %vm70_vm1, %v67_v36 }
  0x77   :  { %603 = vmatmul.msk.f32.gmra.mxu1 %vm188_vm2, %v49_v37 }
  0x7e   :  { %588 = vmatmul.msk.f32.gmra.mxu0 %vm70_vm1, %v68_v38 }
  0x7f   :  { %604 = vmatmul.msk.f32.gmra.mxu1 %vm188_vm2, %v50_v39 }
  0x83   :  { %v140_v40 = vpop.f32.mrf.mxu0 }
  0x84   :  { %v254_v42 = vpop.f32.mrf.mxu1 }
  0x85   :  { %v255_v43 = vadd.f32 %v254_v42, %v140_v40 }
  0x87   :  { %v306_v44 = vadd.f32 %v876_v41, %v255_v43 }
  0x89   :  { %v322_v45 = vmax.f32 %v306_v44, 0.0 }
  0x8b   :  { %v143_v46 = vpop.f32.mrf.mxu0  ;;  %605 = vmatmul.msk.f32.vlgmr.msra.gmra.mxu2 %vm346_vm3, %v322_v45 }
  0x8c   :  { %v257_v47 = vpop.f32.mrf.mxu1 }
  0x8d   :  { %v258_v48 = vadd.f32 %v257_v47, %v143_v46 }
  0x8f   :  { %v307_v49 = vadd.f32 %v876_v41, %v258_v48 }
  0x91   :  { %v323_v50 = vmax.f32 %v307_v49, 0.0 }
  0x93   :  { %v146_v51 = vpop.f32.mrf.mxu0  ;;  %606 = vmatmul.msk.f32.gmra.mxu2 %vm346_vm3, %v323_v50 }
  0x94   :  { %v260_v52 = vpop.f32.mrf.mxu1 }
  0x95   :  { %v261_v53 = vadd.f32 %v260_v52, %v146_v51 }
  0x97   :  { %v308_v54 = vadd.f32 %v876_v41, %v261_v53 }
  0x99   :  { %v324_v55 = vmax.f32 %v308_v54, 0.0 }
  0x9b   :  { %v149_v56 = vpop.f32.mrf.mxu0  ;;  %607 = vmatmul.msk.f32.gmra.mxu2 %vm346_vm3, %v324_v55 }
  0x9c   :  { %v263_v57 = vpop.f32.mrf.mxu1 }
  0x9d   :  { %v264_v58 = vadd.f32 %v263_v57, %v149_v56 }
  0x9f   :  { %v309_v59 = vadd.f32 %v876_v41, %v264_v58 }
  0xa1   :  { %v325_v60 = vmax.f32 %v309_v59, 0.0 }
  0xa3   :  { %v152_v61 = vpop.f32.mrf.mxu0  ;;  %608 = vmatmul.msk.f32.gmra.mxu2 %vm346_vm3, %v325_v60 }
  0xa4   :  { %v266_v62 = vpop.f32.mrf.mxu1 }
  0xa5   :  { %v267_v63 = vadd.f32 %v266_v62, %v152_v61 }
  0xa7   :  { %v310_v0 = vadd.f32 %v876_v41, %v267_v63 }
  0xa9   :  { %v326_v1 = vmax.f32 %v310_v0, 0.0 }
  0xab   :  { %v155_v2 = vpop.f32.mrf.mxu0  ;;  %609 = vmatmul.msk.f32.gmra.mxu2 %vm346_vm3, %v326_v1 }
  0xac   :  { %v269_v3 = vpop.f32.mrf.mxu1 }
  0xad   :  { %v270_v4 = vadd.f32 %v269_v3, %v155_v2 }
  0xaf   :  { %v311_v5 = vadd.f32 %v876_v41, %v270_v4 }
  0xb1   :  { %v327_v6 = vmax.f32 %v311_v5, 0.0 }
  0xb3   :  { %v158_v7 = vpop.f32.mrf.mxu0  ;;  %610 = vmatmul.msk.f32.gmra.mxu2 %vm346_vm3, %v327_v6 }
  0xb4   :  { %v272_v8 = vpop.f32.mrf.mxu1 }
  0xb5   :  { %v273_v9 = vadd.f32 %v272_v8, %v158_v7 }
  0xb7   :  { %v312_v10 = vadd.f32 %v876_v41, %v273_v9 }
  0xb9   :  { %v328_v11 = vmax.f32 %v312_v10, 0.0 }
  0xbb   :  { %v161_v12 = vpop.f32.mrf.mxu0  ;;  %611 = vmatmul.msk.f32.gmra.mxu2 %vm346_vm3, %v328_v11 }
  0xbc   :  { %v275_v13 = vpop.f32.mrf.mxu1 }
  0xbd   :  { %v276_v14 = vadd.f32 %v275_v13, %v161_v12 }
  0xbf   :  { %v313_v15 = vadd.f32 %v876_v41, %v276_v14 }
  0xc1   :  { %v329_v16 = vmax.f32 %v313_v15, 0.0 }
  0xc3   :  { %v164_v17 = vpop.f32.mrf.mxu0  ;;  %612 = vmatmul.msk.f32.gmra.mxu2 %vm346_vm3, %v329_v16 }
  0xc4   :  { %v278_v18 = vpop.f32.mrf.mxu1 }
  0xc5   :  { %v279_v19 = vadd.f32 %v278_v18, %v164_v17 }
  0xc7   :  { %v314_v20 = vadd.f32 %v876_v41, %v279_v19 }
  0xc9   :  { %v330_v21 = vmax.f32 %v314_v20, 0.0 }
  0xcb   :  { %v167_v22 = vpop.f32.mrf.mxu0  ;;  %613 = vmatmul.msk.f32.gmra.mxu2 %vm346_vm3, %v330_v21 }
  0xcc   :  { %v281_v23 = vpop.f32.mrf.mxu1 }
  0xcd   :  { %v282_v24 = vadd.f32 %v281_v23, %v167_v22 }
  0xcf   :  { %v315_v25 = vadd.f32 %v876_v41, %v282_v24 }
  0xd1   :  { %v331_v26 = vmax.f32 %v315_v25, 0.0 }
  0xd3   :  { %v170_v27 = vpop.f32.mrf.mxu0  ;;  %614 = vmatmul.msk.f32.gmra.mxu2 %vm346_vm3, %v331_v26 }
  0xd4   :  { %v284_v28 = vpop.f32.mrf.mxu1 }
  0xd5   :  { %v285_v29 = vadd.f32 %v284_v28, %v170_v27 }
  0xd7   :  { %v316_v30 = vadd.f32 %v876_v41, %v285_v29  ;;  %v477_v29 = vld [vmem:[#allocation2] sm:$0x1] }
  0xd9   :  { %v332_v31 = vmax.f32 %v316_v30, 0.0  ;;  %v669_v30 = vmov 0  }
  0xda   :  { %640 = vset.pattern.permute.xlu0 %v669_v30 }
  0xdb   :  { %v173_v32 = vpop.f32.mrf.mxu0  ;;  %615 = vmatmul.msk.f32.gmra.mxu2 %vm346_vm3, %v332_v31  ;;  %480 = vperm.xlu0 %640, %v477_v29  }
  0xdc   :  { %v287_v33 = vpop.f32.mrf.mxu1 }
  0xdd   :  { %v288_v34 = vadd.f32 %v287_v33, %v173_v32 }
  0xdf   :  { %v317_v35 = vadd.f32 %v876_v41, %v288_v34 }
  0xe1   :  { %v333_v36 = vmax.f32 %v317_v35, 0.0 }
  0xe3   :  { %v176_v37 = vpop.f32.mrf.mxu0  ;;  %616 = vmatmul.msk.f32.gmra.mxu2 %vm346_vm3, %v333_v36 }
  0xe4   :  { %v290_v38 = vpop.f32.mrf.mxu1 }
  0xe5   :  { %v291_v39 = vadd.f32 %v290_v38, %v176_v37 }
  0xe7   :  { %v318_v40 = vadd.f32 %v876_v41, %v291_v39 }
  0xe9   :  { %v334_v42 = vmax.f32 %v318_v40, 0.0 }
  0xeb   :  { %v179_v43 = vpop.f32.mrf.mxu0  ;;  %617 = vmatmul.msk.f32.gmra.mxu2 %vm346_vm3, %v334_v42 }
  0xec   :  { %v293_v44 = vpop.f32.mrf.mxu1 }
  0xed   :  { %v294_v45 = vadd.f32 %v293_v44, %v179_v43 }
  0xef   :  { %v319_v46 = vadd.f32 %v876_v41, %v294_v45  ;;  %v476_v45 = vld [vmem:[%s946_s7] sm:$0x1] }
  0xf1   :  { %v335_v47 = vmax.f32 %v319_v46, 0.0 }
  0xf3   :  { %v182_v48 = vpop.f32.mrf.mxu0  ;;  %618 = vmatmul.msk.f32.gmra.mxu2 %vm346_vm3, %v335_v47 }
  0xf4   :  { %v296_v49 = vpop.f32.mrf.mxu1 }
  0xf5   :  { %v297_v50 = vadd.f32 %v296_v49, %v182_v48 }
  0xf7   :  { %v320_v51 = vadd.f32 %v876_v41, %v297_v50 }
  0xf9   :  { %v336_v52 = vmax.f32 %v320_v51, 0.0 }
  0xfb   :  { %v185_v53 = vpop.f32.mrf.mxu0  ;;  %619 = vmatmul.msk.f32.gmra.mxu2 %vm346_vm3, %v336_v52 }
  0xfc   :  { %v299_v54 = vpop.f32.mrf.mxu1 }
  0xfd   :  { %v300_v55 = vadd.f32 %v299_v54, %v185_v53 }
  0xff   :  { %v321_v56 = vadd.f32 %v876_v41, %v300_v55  ;;  %v642_v41 = vld [vmem:[%s945_s6] ss:$0 sm:$0xff] }
 0x101   :  { %v337_v57 = vmax.f32 %v321_v56, 0.0 }
 0x103   :  { %620 = vmatmul.msk.f32.gmra.mxu2 %vm346_vm3, %v337_v57 }
 0x10e   :  { %v910_v58 = vpop.f32.mrf.mxu2 }
 0x10f   :  { %v413_v42 = vadd.f32 %v642_v41, %v910_v58 }
 0x111   :  { %v460_v44 = vmax.f32 %v413_v42, 0.0 }
 0x116   :  { %v415_v59 = vpop.f32.mrf.mxu2 }
 0x117   :  { %v416_v39 = vadd.f32 %v642_v41, %v415_v59 }
 0x119   :  { %v461_v43 = vmax.f32 %v416_v39, 0.0 }
 0x11e   :  { %v418_v60 = vpop.f32.mrf.mxu2 }
 0x11f   :  { %v419_v37 = vadd.f32 %v642_v41, %v418_v60 }
 0x121   :  { %v462_v40 = vmax.f32 %v419_v37, 0.0 }
 0x126   :  { %v421_v61 = vpop.f32.mrf.mxu2 }
 0x127   :  { %v422_v35 = vadd.f32 %v642_v41, %v421_v61 }
 0x129   :  { %v463_v38 = vmax.f32 %v422_v35, 0.0 }
 0x12e   :  { %v424_v62 = vpop.f32.mrf.mxu2 }
 0x12f   :  { %v425_v33 = vadd.f32 %v642_v41, %v424_v62 }
 0x131   :  { %v464_v36 = vmax.f32 %v425_v33, 0.0 }
 0x136   :  { %v427_v63 = vpop.f32.mrf.mxu2 }
 0x137   :  { %v428_v31 = vadd.f32 %v642_v41, %v427_v63 }
 0x139   :  { %v465_v34 = vmax.f32 %v428_v31, 0.0 }
 0x13e   :  { %v430_v0 = vpop.f32.mrf.mxu2 }
 0x13f   :  { %v431_v27 = vadd.f32 %v642_v41, %v430_v0 }
 0x141   :  { %v466_v32 = vmax.f32 %v431_v27, 0.0 }
 0x146   :  { %v433_v1 = vpop.f32.mrf.mxu2 }
 0x147   :  { %v434_v25 = vadd.f32 %v642_v41, %v433_v1 }
 0x149   :  { %v467_v28 = vmax.f32 %v434_v25, 0.0 }
 0x14d   :  { %v481_v46 = vpop.permute.xlu0 %480 }
 0x14e   :  { %v436_v2 = vpop.f32.mrf.mxu2  ;;  %v483_v47 = vperm.slane %v481_v46, 0 }
 0x14f   :  { %v437_v23 = vadd.f32 %v642_v41, %v436_v2 }
 0x151   :  { %v468_v26 = vmax.f32 %v437_v23, 0.0 }
 0x156   :  { %v439_v3 = vpop.f32.mrf.mxu2 }
 0x157   :  { %v440_v21 = vadd.f32 %v642_v41, %v439_v3 }
 0x159   :  { %v469_v24 = vmax.f32 %v440_v21, 0.0 }
 0x15e   :  { %v442_v4 = vpop.f32.mrf.mxu2 }
 0x15f   :  { %v443_v19 = vadd.f32 %v642_v41, %v442_v4 }
 0x161   :  { %v470_v22 = vmax.f32 %v443_v19, 0.0 }
 0x166   :  { %v445_v5 = vpop.f32.mrf.mxu2 }
 0x167   :  { %v446_v17 = vadd.f32 %v642_v41, %v445_v5 }
 0x169   :  { %v471_v20 = vmax.f32 %v446_v17, 0.0 }
 0x16e   :  { %v448_v6 = vpop.f32.mrf.mxu2 }
 0x16f   :  { %v449_v15 = vadd.f32 %v642_v41, %v448_v6 }
 0x171   :  { %v472_v18 = vmax.f32 %v449_v15, 0.0 }
 0x176   :  { %v451_v7 = vpop.f32.mrf.mxu2 }
 0x177   :  { %v452_v13 = vadd.f32 %v642_v41, %v451_v7 }
 0x179   :  { %v473_v16 = vmax.f32 %v452_v13, 0.0 }
 0x17e   :  { %v454_v8 = vpop.f32.mrf.mxu2 }
 0x17f   :  { %v455_v11 = vadd.f32 %v642_v41, %v454_v8 }
 0x181   :  { %v474_v14 = vmax.f32 %v455_v11, 0.0 }
 0x186   :  { %v457_v9 = vpop.f32.mrf.mxu2 }
 0x187   :  { %v458_v10 = vadd.f32 %v642_v41, %v457_v9 }
 0x189   :  { %v475_v12 = vmax.f32 %v458_v10, 0.0 }
 0x18b   :  { %621 = vmatpush.xpose.msk.msra.mxu3 %vm346_vm3, %v475_v12 }
 0x18f   :  { %622 = vmatpush.xpose.msk.msra.mxu3 %vm346_vm3, %v474_v14 }
 0x193   :  { %623 = vmatpush.xpose.msk.msra.mxu3 %vm346_vm3, %v473_v16 }
 0x197   :  { %624 = vmatpush.xpose.msk.msra.mxu3 %vm346_vm3, %v472_v18 }
 0x19b   :  { %625 = vmatpush.xpose.msk.msra.mxu3 %vm346_vm3, %v471_v20 }
 0x19f   :  { %626 = vmatpush.xpose.msk.msra.mxu3 %vm346_vm3, %v470_v22 }
 0x1a3   :  { %627 = vmatpush.xpose.msk.msra.mxu3 %vm346_vm3, %v469_v24 }
 0x1a7   :  { %628 = vmatpush.xpose.msk.msra.mxu3 %vm346_vm3, %v468_v26 }
 0x1ab   :  { %629 = vmatpush.xpose.msk.msra.mxu3 %vm346_vm3, %v467_v28 }
 0x1af   :  { %630 = vmatpush.xpose.msk.msra.mxu3 %vm346_vm3, %v466_v32 }
 0x1b3   :  { %631 = vmatpush.xpose.msk.msra.mxu3 %vm346_vm3, %v465_v34 }
 0x1b7   :  { %632 = vmatpush.xpose.msk.msra.mxu3 %vm346_vm3, %v464_v36 }
 0x1bb   :  { %633 = vmatpush.xpose.msk.msra.mxu3 %vm346_vm3, %v463_v38 }
 0x1bf   :  { %634 = vmatpush.xpose.msk.msra.mxu3 %vm346_vm3, %v462_v40 }
 0x1c3   :  { %635 = vmatpush.xpose.msk.msra.mxu3 %vm346_vm3, %v461_v43 }
 0x1c7   :  { %636 = vmatpush.xpose.msk.msra.mxu3 %vm346_vm3, %v460_v44 }
 0x1ca   :  { %637 = vmatmul.msk.f32.vlgmr.msra.gmra.mxu3 %vm346_vm3, %v476_v45 }
 0x24d   :  { %v552_v48 = vpop.f32.mrf.mxu3 }
 0x24e   :  { %v553_v49 = vadd.f32 %v552_v48, %v483_v47 }
 0x250   :  { %555 = vst [vmem:[#allocation3] sm:$0x1] %v553_v49 }
 0x251   :  { %566 = dma.vmem_to_hbm [thread:$0]  %s562_s8, 16, %s564_s2, [#allocation4]  }
 0x252   :  { %667 = dma.done.wait [#allocation4], 16  }
 0x253   :  { %668 = vsyncadd [#allocation4], 4294967280 }
 0x254   :  { %571 = vsyncpa [#allocation4], 1 }

</bundles_post_ra>
